<compile_context>
chip_gen: v7x
topology: tpu7x:2x2x1
jax: 0.10.0
libtpu: 0.0.40
codegen_flags: <defaults>
</compile_context>

<pallas_src>
import jax
import jax.numpy as jnp
from jax.experimental import pallas as pl
from jax.experimental.pallas import tpu as pltpu

LANE = 128


def _round_up(x, m):
    return (x + m - 1) // m * m


def _pad2d(x, rows, cols):
    return jnp.pad(x, ((0, rows - x.shape[0]), (0, cols - x.shape[1])))


def fused_gcn_kernel(adj_ref, x_ref, w1_ref, b1_ref, w2_ref, b2_ref, o_ref, h1_ref):
    """Fused 2-layer GCN: out = relu(A @ (relu(A @ (X@W1 + b1)) @ W2 + b2)).

    All operands are zero-padded to multiples of 128 lanes. MXU matmuls use
    bf16 operands with f32 accumulation. The N^2-scaled contraction runs over
    the feature dim (X@W first, then A@(XW)), which is optimal since
    out_feats <= in_feats for both layers.
    """
    f32 = jnp.float32
    bf16 = jnp.bfloat16

    adj_bf = adj_ref[...].astype(bf16)  # reused by both layers (A read once)

    # ---- Layer 1: hid = relu(A @ (X @ W1 + b1)) -> VMEM scratch ----
    xw1 = jnp.dot(x_ref[...].astype(bf16), w1_ref[...].astype(bf16),
                  preferred_element_type=f32) + b1_ref[...]
    agg1 = jnp.dot(adj_bf, xw1.astype(bf16), preferred_element_type=f32)
    h1_ref[...] = jnp.maximum(agg1, 0.0)

    # ---- Layer 2: out = relu(A @ (H1 @ W2 + b2)) ----
    xw2 = jnp.dot(h1_ref[...].astype(bf16), w2_ref[...].astype(bf16),
                  preferred_element_type=f32) + b2_ref[...]
    agg2 = jnp.dot(adj_bf, xw2.astype(bf16), preferred_element_type=f32)
    o_ref[...] = jnp.maximum(agg2, 0.0).astype(o_ref.dtype)


def gcn_forward(adj, features, params):
    """Two-layer GCN forward pass, fused into a single Pallas call."""
    (w1, b1), (w2, b2) = params
    n, in_f = features.shape
    hid_f = w1.shape[1]
    out_f = w2.shape[1]

    # Pad everything to lane-dense, MXU-aligned shapes (zero pad is exact:
    # padded adjacency columns are zero, so padded-row biases never leak in).
    n_p = _round_up(n, LANE)
    in_p = _round_up(in_f, LANE)
    hid_p = _round_up(hid_f, LANE)
    out_p = _round_up(out_f, LANE)

    adj_p = _pad2d(adj, n_p, n_p)
    x_p = _pad2d(features, n_p, in_p)
    w1_p = _pad2d(w1, in_p, hid_p)
    b1_p = _pad2d(b1.reshape(1, -1), 1, hid_p)
    w2_p = _pad2d(w2, hid_p, out_p)
    b2_p = _pad2d(b2.reshape(1, -1), 1, out_p)

    flops = 2 * n_p * (in_p * hid_p + n_p * hid_p + hid_p * out_p + n_p * out_p)
    bytes_accessed = 4 * (adj_p.size + x_p.size + w1_p.size + b1_p.size
                          + w2_p.size + b2_p.size + n_p * out_p)

    def full(arr):
        return pl.BlockSpec(arr.shape, lambda: (0, 0))

    out = pl.pallas_call(
        fused_gcn_kernel,
        out_shape=jax.ShapeDtypeStruct((n_p, out_p), jnp.float32),
        in_specs=[full(adj_p), full(x_p), full(w1_p), full(b1_p),
                  full(w2_p), full(b2_p)],
        out_specs=pl.BlockSpec((n_p, out_p), lambda: (0, 0)),
        scratch_shapes=[pltpu.VMEM((n_p, hid_p), jnp.float32)],
        compiler_params=pltpu.CompilerParams(
            vmem_limit_bytes=32 * 1024 * 1024),
        cost_estimate=pl.CostEstimate(
            flops=flops, transcendentals=0, bytes_accessed=bytes_accessed),
    )(adj_p, x_p, w1_p, b1_p, w2_p, b2_p)

    return out[:n, :out_f]


def init_params(key, in_size, hid_size, out_size):
    """Deterministic init mimicking nn.Linear default (uniform +/- 1/sqrt(fan_in)).
    Weights stored as [in_feats, out_feats] (transposed vs PyTorch)."""
    params = []
    dims = [(in_size, hid_size), (hid_size, out_size)]
    for (fi, fo) in dims:
        key, kw, kb = jax.random.split(key, 3)
        bound = 1.0 / jnp.sqrt(fi)
        w = jax.random.uniform(kw, (fi, fo), jnp.float32, -bound, bound)
        b = jax.random.uniform(kb, (fo,), jnp.float32, -bound, bound)
        params.append((w, b))
    return params


if __name__ == "__main__":
    key = jax.random.PRNGKey(0)
    k_feat, k_adj, k_mask, k_param = jax.random.split(key, 4)

    # Small synthetic graph: 64 nodes, in=32, hid=32, out=16.
    N, IN_SIZE, HID_SIZE, OUT_SIZE = 64, 32, 32, 16

    features = jax.random.normal(k_feat, (N, IN_SIZE), jnp.float32)

    # Dense weighted adjacency: random sparsity pattern with random edge weights.
    edge_w = jax.random.uniform(k_adj, (N, N), jnp.float32)
    mask = (jax.random.uniform(k_mask, (N, N)) < 0.2).astype(jnp.float32)
    adj = edge_w * mask  # A[dst, src] = edge weight (0 if no edge)

    params = init_params(k_param, IN_SIZE, HID_SIZE, OUT_SIZE)

    out = gcn_forward(adj, features, params)
    out = jax.block_until_ready(out)
    assert out.shape == (N, OUT_SIZE)

    # Pure-JAX reference of the same math (unpadded, with matching bf16 MXU
    # operands and f32 accumulation).
    bf16 = jnp.bfloat16
    h_ref = features
    for (w, b) in params:
        xw = jnp.dot(h_ref.astype(bf16), w.astype(bf16),
                     preferred_element_type=jnp.float32) + b
        agg = jnp.dot(adj.astype(bf16), xw.astype(bf16),
                      preferred_element_type=jnp.float32)
        h_ref = jnp.maximum(agg, 0.0)

    assert jnp.allclose(out, h_ref, atol=2e-3, rtol=2e-3)

    print("KERNEL_OK")
</pallas_src>

<mosaic_0001>
module attributes {stable_mosaic.version = 11 : i64} {
  func.func @fused_gcn_kernel(%arg0: memref<128x128xf32, #tpu.memory_space<vmem>>, %arg1: memref<128x128xf32, #tpu.memory_space<vmem>>, %arg2: memref<128x128xf32, #tpu.memory_space<vmem>>, %arg3: memref<1x128xf32, #tpu.memory_space<vmem>>, %arg4: memref<128x128xf32, #tpu.memory_space<vmem>>, %arg5: memref<1x128xf32, #tpu.memory_space<vmem>>, %arg6: memref<128x128xf32, #tpu.memory_space<vmem>>, %arg7: memref<128x128xf32, #tpu.memory_space<vmem>>) attributes {dimension_semantics = [], scalar_prefetch = 0 : i64, scratch_operands = 1 : i64, tpu.core_type = #tpu.core_type<tc>} {
    %c0 = arith.constant 0 : index
    %c0_0 = arith.constant 0 : index
    %0 = vector.load %arg0[%c0, %c0_0] : memref<128x128xf32, #tpu.memory_space<vmem>>, vector<128x128xf32>
    %1 = arith.truncf %0 : vector<128x128xf32> to vector<128x128xbf16>
    %c0_1 = arith.constant 0 : index
    %c0_2 = arith.constant 0 : index
    %2 = vector.load %arg1[%c0_1, %c0_2] : memref<128x128xf32, #tpu.memory_space<vmem>>, vector<128x128xf32>
    %3 = arith.truncf %2 : vector<128x128xf32> to vector<128x128xbf16>
    %c0_3 = arith.constant 0 : index
    %c0_4 = arith.constant 0 : index
    %4 = vector.load %arg2[%c0_3, %c0_4] : memref<128x128xf32, #tpu.memory_space<vmem>>, vector<128x128xf32>
    %5 = arith.truncf %4 : vector<128x128xf32> to vector<128x128xbf16>
    %cst = arith.constant dense<0.000000e+00> : vector<128x128xf32>
    %6 = tpu.matmul %3, %5, %cst {dimension_numbers = #tpu.dot_dimension_numbers<[1], [0], [0], [1], [0, 0, 1, 1], [], []>} : vector<128x128xbf16>, vector<128x128xbf16>, vector<128x128xf32> -> vector<128x128xf32>
    %c0_5 = arith.constant 0 : index
    %c0_6 = arith.constant 0 : index
    %7 = vector.load %arg3[%c0_5, %c0_6] : memref<1x128xf32, #tpu.memory_space<vmem>>, vector<1x128xf32>
    %8 = vector.broadcast %7 : vector<1x128xf32> to vector<128x128xf32>
    %9 = arith.addf %6, %8 : vector<128x128xf32>
    %10 = arith.truncf %9 : vector<128x128xf32> to vector<128x128xbf16>
    %cst_7 = arith.constant dense<0.000000e+00> : vector<128x128xf32>
    %11 = tpu.matmul %1, %10, %cst_7 {dimension_numbers = #tpu.dot_dimension_numbers<[1], [0], [0], [1], [0, 0, 1, 1], [], []>} : vector<128x128xbf16>, vector<128x128xbf16>, vector<128x128xf32> -> vector<128x128xf32>
    %cst_8 = arith.constant 0.000000e+00 : f32
    %12 = vector.broadcast %cst_8 : f32 to vector<128x128xf32>
    %13 = arith.maximumf %11, %12 : vector<128x128xf32>
    %c0_9 = arith.constant 0 : index
    %c0_10 = arith.constant 0 : index
    %14 = vector.load %arg7[%c0_9, %c0_10] : memref<128x128xf32, #tpu.memory_space<vmem>>, vector<128x128xf32>
    tpu.vector_store %arg7[%c0_9, %c0_10], %13 {strides = array<i32>} : memref<128x128xf32, #tpu.memory_space<vmem>>, vector<128x128xf32>,
    %c0_11 = arith.constant 0 : index
    %c0_12 = arith.constant 0 : index
    %15 = vector.load %arg7[%c0_11, %c0_12] : memref<128x128xf32, #tpu.memory_space<vmem>>, vector<128x128xf32>
    %16 = arith.truncf %15 : vector<128x128xf32> to vector<128x128xbf16>
    %c0_13 = arith.constant 0 : index
    %c0_14 = arith.constant 0 : index
    %17 = vector.load %arg4[%c0_13, %c0_14] : memref<128x128xf32, #tpu.memory_space<vmem>>, vector<128x128xf32>
    %18 = arith.truncf %17 : vector<128x128xf32> to vector<128x128xbf16>
    %cst_15 = arith.constant dense<0.000000e+00> : vector<128x128xf32>
    %19 = tpu.matmul %16, %18, %cst_15 {dimension_numbers = #tpu.dot_dimension_numbers<[1], [0], [0], [1], [0, 0, 1, 1], [], []>} : vector<128x128xbf16>, vector<128x128xbf16>, vector<128x128xf32> -> vector<128x128xf32>
    %c0_16 = arith.constant 0 : index
    %c0_17 = arith.constant 0 : index
    %20 = vector.load %arg5[%c0_16, %c0_17] : memref<1x128xf32, #tpu.memory_space<vmem>>, vector<1x128xf32>
    %21 = vector.broadcast %20 : vector<1x128xf32> to vector<128x128xf32>
    %22 = arith.addf %19, %21 : vector<128x128xf32>
    %23 = arith.truncf %22 : vector<128x128xf32> to vector<128x128xbf16>
    %cst_18 = arith.constant dense<0.000000e+00> : vector<128x128xf32>
    %24 = tpu.matmul %1, %23, %cst_18 {dimension_numbers = #tpu.dot_dimension_numbers<[1], [0], [0], [1], [0, 0, 1, 1], [], []>} : vector<128x128xbf16>, vector<128x128xbf16>, vector<128x128xf32> -> vector<128x128xf32>
    %cst_19 = arith.constant 0.000000e+00 : f32
    %25 = vector.broadcast %cst_19 : f32 to vector<128x128xf32>
    %26 = arith.maximumf %24, %25 : vector<128x128xf32>
    %c0_20 = arith.constant 0 : index
    %c0_21 = arith.constant 0 : index
    %27 = vector.load %arg6[%c0_20, %c0_21] : memref<128x128xf32, #tpu.memory_space<vmem>>, vector<128x128xf32>
    tpu.vector_store %arg6[%c0_20, %c0_21], %26 {strides = array<i32>} : memref<128x128xf32, #tpu.memory_space<vmem>>, vector<128x128xf32>,
    return
  }
}

</mosaic_0001>

<bundles_post_ra>
// kernel: tpu_custom_call.1
= control target key start
LH: loop header
LB: loop body
LE: loop exit
PB: predicated region body
PF: predicated region fallthrough
CT: control target
= control target key end

     0   :  { %11 = vsyncpa [#allocation4], 0  ;;  %s1189_s0 = inlined_call_operand.hbm [shape: f32[128,128], index: 0, kind: input, shape index: {}]   ;;  %s1190_s1 = inlined_call_operand.hbm [shape: f32[128,128], index: 1, kind: input, shape index: {}]   ;;  %s1191_s2 = inlined_call_operand.hbm [shape: f32[128,128], index: 2, kind: input, shape index: {}]   ;;  %s1192_s3 = inlined_call_operand.vmem [shape: f32[1,128], index: 3, kind: input, shape index: {}]   ;;  %s1193_s4 = inlined_call_operand.hbm [shape: f32[128,128], index: 4, kind: input, shape index: {}]   ;;  %s1194_s5 = inlined_call_operand.vmem [shape: f32[1,128], index: 5, kind: input, shape index: {}]   ;;  %s1195_s6 = inlined_call_operand.hbm [shape: f32[128,128], index: 6, kind: output, shape index: {}]  }
   0x1   :  { %12 = vsyncpa [#allocation7], 0 }
   0x2   :  { %13 = vsyncpa [#allocation10], 0 }
   0x3   :  { %14 = vsyncpa [#allocation5], 0  ;;  %s1020_s21 = smov [#allocation6]   ;;  %s1021_s23 = smov [#allocation3]  }
   0x4   :  { %s32_s22 = sshll.u32 %s1020_s21, 4  ;;  %s20_s24 = sshll.u32 %s1021_s23, 4  ;;  %s33_s22 = int_to_ptr.vmem [resolvable:$true] %s32_s22  ;;  %s1062_s24 = int_to_ptr.vmem [resolvable:$true] %s20_s24 }
   0x5   :  { %s902_s27 = scalar_lea.hbm %s1190_s1, 2048 }
   0x6   :  { %p903_p0 = scmp.ne.s32.totalorder %s1190_s1, %s902_s27  ;;  %p906_p1 = scmp.lt.u32.totalorder %s902_s27, %s1190_s1 }
   0x8   :  { %p908_p2 = pnand %p906_p1, %p903_p0 }
   0xa   :  { %911 = shalt.err (!%p908_p2)
}
   0xb   :  { %s912_s8 = scalar_lea.vmem %s33_s22, 2048  ;;  %p917_p4 = scmp.lt.s32.totalorder %s33_s22, %s33_s22 }
   0xc   :  { %p913_p3 = scmp.ne.s32.totalorder %s33_s22, %s912_s8  ;;  %p918_p5 = scmp.lt.s32.totalorder %s912_s8, %s912_s8 }
   0xe   :  { %p919_p6 = por %p918_p5, %p917_p4 }
  0x10   :  { %p920_p7 = pnand %p919_p6, %p913_p3 }
  0x12   :  { %923 = shalt.err (!%p920_p7)
}
  0x13   :  { %s1022_s9 = smov 128   ;;  %s1023_s10 = smov 8  }
  0x14   :  { %38 = dma.hbm_to_vmem [thread:$0]  %s1190_s1, 2048, %s33_s22, [#allocation7], %s1022_s9, %s1022_s9, %s1023_s10  }
  0x15   :  { %s924_s15 = scalar_lea.hbm %s1189_s0, 2048 }
  0x16   :  { %p925_p8 = scmp.ne.s32.totalorder %s1189_s0, %s924_s15  ;;  %p928_p9 = scmp.lt.u32.totalorder %s924_s15, %s1189_s0 }
  0x18   :  { %p930_p10 = pnand %p928_p9, %p925_p8 }
  0x1a   :  { %933 = shalt.err (!%p930_p10)
}
  0x1b   :  { %s934_s20 = scalar_lea.vmem %s1062_s24, 2048  ;;  %p939_p12 = scmp.lt.s32.totalorder %s1062_s24, %s1062_s24 }
  0x1c   :  { %p935_p11 = scmp.ne.s32.totalorder %s1062_s24, %s934_s20  ;;  %p940_p13 = scmp.lt.s32.totalorder %s934_s20, %s934_s20 }
  0x1e   :  { %p941_p0 = por %p940_p13, %p939_p12 }
  0x20   :  { %p942_p1 = pnand %p941_p0, %p935_p11 }
  0x22   :  { %945 = shalt.err (!%p942_p1)
}
  0x23   :  { %26 = dma.hbm_to_vmem [thread:$0]  %s1189_s0, 2048, %s1062_s24, [#allocation4], %s1022_s9, %s1022_s9, %s1023_s10  }
  0x24   :  { %s1024_s22 = smov [#allocation8]   ;;  %s1025_s25 = smov [#allocation9]  }
  0x25   :  { %s44_s23 = sshll.u32 %s1024_s22, 4  ;;  %s58_s26 = sshll.u32 %s1025_s25, 4  ;;  %s45_s23 = int_to_ptr.vmem [resolvable:$true] %s44_s23  ;;  %s1099_s26 = int_to_ptr.vmem [resolvable:$true] %s58_s26 }
  0x26   :  { %s946_s29 = scalar_lea.hbm %s1191_s2, 2048 }
  0x27   :  { %p947_p2 = scmp.ne.s32.totalorder %s1191_s2, %s946_s29  ;;  %p950_p3 = scmp.lt.u32.totalorder %s946_s29, %s1191_s2 }
  0x29   :  { %p952_p4 = pnand %p950_p3, %p947_p2 }
  0x2b   :  { %955 = shalt.err (!%p952_p4)
}
  0x2c   :  { %s956_s0 = scalar_lea.vmem %s45_s23, 2048  ;;  %p961_p6 = scmp.lt.s32.totalorder %s45_s23, %s45_s23 }
  0x2d   :  { %p957_p5 = scmp.ne.s32.totalorder %s45_s23, %s956_s0  ;;  %p962_p7 = scmp.lt.s32.totalorder %s956_s0, %s956_s0 }
  0x2f   :  { %p963_p8 = por %p962_p7, %p961_p6 }
  0x31   :  { %p964_p9 = pnand %p963_p8, %p957_p5 }
  0x33   :  { %967 = shalt.err (!%p964_p9)
}
  0x34   :  { %50 = dma.hbm_to_vmem [thread:$0]  %s1191_s2, 2048, %s45_s23, [#allocation7], %s1022_s9, %s1022_s9, %s1023_s10  }
  0x35   :  { %s968_s15 = scalar_lea.hbm %s1193_s4, 2048 }
  0x36   :  { %p969_p10 = scmp.ne.s32.totalorder %s1193_s4, %s968_s15  ;;  %p972_p11 = scmp.lt.u32.totalorder %s968_s15, %s1193_s4 }
  0x38   :  { %p974_p12 = pnand %p972_p11, %p969_p10 }
  0x3a   :  { %977 = shalt.err (!%p974_p12)
}
  0x3b   :  { %s978_s20 = scalar_lea.vmem %s1099_s26, 2048  ;;  %p983_p0 = scmp.lt.s32.totalorder %s1099_s26, %s1099_s26 }
  0x3c   :  { %p979_p13 = scmp.ne.s32.totalorder %s1099_s26, %s978_s20  ;;  %p984_p1 = scmp.lt.s32.totalorder %s978_s20, %s978_s20 }
  0x3e   :  { %p985_p2 = por %p984_p1, %p983_p0 }
  0x40   :  { %p986_p3 = pnand %p985_p2, %p979_p13 }
  0x42   :  { %989 = shalt.err (!%p986_p3)
}
  0x43   :  { %64 = dma.hbm_to_vmem [thread:$0]  %s1193_s4, 2048, %s1099_s26, [#allocation10], %s1022_s9, %s1022_s9, %s1023_s10  }
  0x44   :  { %1012 = dma.done.wait [#allocation4], 2048  }
  0x45   :  { %1013 = vsyncadd [#allocation4], 4294965248 }
  0x46   :  { %1014 = dma.done.wait [#allocation7], 4096  }
  0x47   :  { %1015 = vsyncadd [#allocation7], 4294963200 }
  0x48   :  { %1016 = dma.done.wait [#allocation10], 2048  }
  0x49   :  { %1017 = vsyncadd [#allocation10], 4294965248  ;;  %v128_v0 = vld [vmem:[#allocation8] sm:$0xff]  ;;  %v129_v1 = vld [vmem:[#allocation8 + $0x8] sm:$0xff] }
  0x4a   :  { %v130_v2 = vld [vmem:[#allocation8 + $0x10] sm:$0xff]  ;;  %v144_v3 = vpack.c.bf16 %v129_v1, %v128_v0  ;;  %v131_v4 = vld [vmem:[#allocation8 + $0x18] sm:$0xff]  ;;  %v132_v6 = vld [vmem:[#allocation8 + $0x20] sm:$0xff] }
  0x4b   :  { %v145_v5 = vpack.c.bf16 %v131_v4, %v130_v2  ;;  %v133_v7 = vld [vmem:[#allocation8 + $0x28] sm:$0xff]  ;;  %v104_v9 = vld [vmem:[#allocation6] sm:$0xff]  ;;  %v134_v11 = vld [vmem:[#allocation8 + $0x30] sm:$0xff] }
  0x4c   :  { %767 = vmatprep.subr.bf16.mxu0 %v144_v3  ;;  %v146_v8 = vpack.c.bf16 %v133_v7, %v132_v6  ;;  %v105_v10 = vld [vmem:[#allocation6 + $0x8] sm:$0xff]  ;;  %v135_v12 = vld [vmem:[#allocation8 + $0x38] sm:$0xff]  ;;  %v136_v15 = vld [vmem:[#allocation8 + $0x40] sm:$0xff] }
  0x4d   :  { %768 = vmatpush3.bf16.msra.mxu0 %v144_v3  ;;  %v120_v13 = vpack.c.bf16 %v105_v10, %v104_v9  ;;  %v147_v14 = vpack.c.bf16 %v135_v12, %v134_v11  ;;  %v137_v16 = vld [vmem:[#allocation8 + $0x48] sm:$0xff]  ;;  %v138_v18 = vld [vmem:[#allocation8 + $0x50] sm:$0xff]  ;;  %v139_v19 = vld [vmem:[#allocation8 + $0x58] sm:$0xff] }
  0x4e   :  { %769 = vmatprep.subr.bf16.mxu0 %v145_v5  ;;  %v148_v17 = vpack.c.bf16 %v137_v16, %v136_v15  ;;  %v149_v20 = vpack.c.bf16 %v139_v19, %v138_v18  ;;  %v140_v21 = vld [vmem:[#allocation8 + $0x60] sm:$0xff]  ;;  %v141_v22 = vld [vmem:[#allocation8 + $0x68] sm:$0xff]  ;;  %v142_v24 = vld [vmem:[#allocation8 + $0x70] sm:$0xff] }
  0x4f   :  { %783 = vmatprep.mubr.bf16.mxu0 %v120_v13  ;;  %v150_v23 = vpack.c.bf16 %v141_v22, %v140_v21  ;;  %v143_v25 = vld [vmem:[#allocation8 + $0x78] sm:$0xff]  ;;  %v106_v27 = vld [vmem:[#allocation6 + $0x10] sm:$0xff]  ;;  %v108_v29 = vld [vmem:[#allocation6 + $0x20] sm:$0xff] }
  0x50   :  { %v151_v26 = vpack.c.bf16 %v143_v25, %v142_v24  ;;  %v107_v28 = vld [vmem:[#allocation6 + $0x18] sm:$0xff]  ;;  %v109_v30 = vld [vmem:[#allocation6 + $0x28] sm:$0xff]  ;;  %v110_v33 = vld [vmem:[#allocation6 + $0x30] sm:$0xff] }
  0x51   :  { %770 = vmatpush3.bf16.msra.mxu0 %v145_v5  ;;  %v121_v31 = vpack.c.bf16 %v107_v28, %v106_v27  ;;  %v122_v32 = vpack.c.bf16 %v109_v30, %v108_v29  ;;  %v111_v34 = vld [vmem:[#allocation6 + $0x38] sm:$0xff]  ;;  %v112_v35 = vld [vmem:[#allocation6 + $0x40] sm:$0xff]  ;;  %v113_v36 = vld [vmem:[#allocation6 + $0x48] sm:$0xff] }
  0x52   :  { %771 = vmatprep.subr.bf16.mxu0 %v146_v8  ;;  %v123_v37 = vpack.c.bf16 %v111_v34, %v110_v33  ;;  %v124_v38 = vpack.c.bf16 %v113_v36, %v112_v35  ;;  %v114_v39 = vld [vmem:[#allocation6 + $0x50] sm:$0xff]  ;;  %v115_v40 = vld [vmem:[#allocation6 + $0x58] sm:$0xff]  ;;  %v116_v41 = vld [vmem:[#allocation6 + $0x60] sm:$0xff] }
  0x53   :  { %v117_v42 = vld [vmem:[#allocation6 + $0x68] sm:$0xff]  ;;  %v125_v43 = vpack.c.bf16 %v115_v40, %v114_v39  ;;  %v118_v45 = vld [vmem:[#allocation6 + $0x70] sm:$0xff]  ;;  %v119_v46 = vld [vmem:[#allocation6 + $0x78] sm:$0xff] }
  0x54   :  { %v126_v44 = vpack.c.bf16 %v117_v42, %v116_v41  ;;  %v127_v47 = vpack.c.bf16 %v119_v46, %v118_v45  ;;  %v80_v48 = vld [vmem:[#allocation3] sm:$0xff]  ;;  %v81_v49 = vld [vmem:[#allocation3 + $0x8] sm:$0xff]  ;;  %v419_v53 = vld [vmem:[#allocation9 + $0x10] sm:$0xff] }
  0x55   :  { %772 = vmatpush3.bf16.msra.mxu0 %v146_v8  ;;  %v1136_v50 = vpack.c.bf16 %v81_v49, %v80_v48  ;;  %v417_v51 = vld [vmem:[#allocation9] sm:$0xff]  ;;  %v418_v52 = vld [vmem:[#allocation9 + $0x8] sm:$0xff]  ;;  %v420_v55 = vld [vmem:[#allocation9 + $0x18] sm:$0xff] }
  0x56   :  { %773 = vmatprep.subr.bf16.mxu0 %v147_v14  ;;  %v433_v54 = vpack.c.bf16 %v418_v52, %v417_v51  ;;  %v434_v56 = vpack.c.bf16 %v420_v55, %v419_v53  ;;  %v421_v57 = vld [vmem:[#allocation9 + $0x20] sm:$0xff]  ;;  %v422_v58 = vld [vmem:[#allocation9 + $0x28] sm:$0xff]  ;;  %v423_v60 = vld [vmem:[#allocation9 + $0x30] sm:$0xff] }
  0x57   :  { %815 = vmatprep.mubr.bf16.mxu1 %v1136_v50  ;;  %v435_v59 = vpack.c.bf16 %v422_v58, %v421_v57  ;;  %v424_v61 = vld [vmem:[#allocation9 + $0x38] sm:$0xff]  ;;  %v425_v63 = vld [vmem:[#allocation9 + $0x40] sm:$0xff]  ;;  %v426_v0 = vld [vmem:[#allocation9 + $0x48] sm:$0xff] }
  0x58   :  { %v436_v62 = vpack.c.bf16 %v424_v61, %v423_v60  ;;  %v437_v1 = vpack.c.bf16 %v426_v0, %v425_v63  ;;  %v427_v2 = vld [vmem:[#allocation9 + $0x50] sm:$0xff]  ;;  %v428_v3 = vld [vmem:[#allocation9 + $0x58] sm:$0xff]  ;;  %v701_v6 = vld [vmem:[%s1192_s3] ss:$0 sm:$0xff] }
  0x59   :  { %774 = vmatpush3.bf16.msra.mxu0 %v147_v14  ;;  %v438_v4 = vpack.c.bf16 %v428_v3, %v427_v2  ;;  %v82_v46 = vld [vmem:[#allocation3 + $0x10] sm:$0xff]  ;;  %v84_v48 = vld [vmem:[#allocation3 + $0x20] sm:$0xff]  ;;  %v85_v49 = vld [vmem:[#allocation3 + $0x28] sm:$0xff] }
  0x5a   :  { %775 = vmatprep.subr.bf16.mxu0 %v148_v17  ;;  %v1144_v52 = vpack.c.bf16 %v85_v49, %v84_v48  ;;  %v86_v53 = vld [vmem:[#allocation3 + $0x30] sm:$0xff]  ;;  %v88_v55 = vld [vmem:[#allocation3 + $0x40] sm:$0xff]  ;;  %v91_v60 = vld [vmem:[#allocation3 + $0x58] sm:$0xff] }
  0x5b   :  { %v92_v61 = vld [vmem:[#allocation3 + $0x60] sm:$0xff]  ;;  %v95_v2 = vld [vmem:[#allocation3 + $0x78] sm:$0xff] }
  0x5d   :  { %776 = vmatpush3.bf16.msra.mxu0 %v148_v17 }
  0x5e   :  { %777 = vmatprep.subr.bf16.mxu0 %v149_v20 }
  0x61   :  { %778 = vmatpush3.bf16.msra.mxu0 %v149_v20 }
  0x62   :  { %779 = vmatprep.subr.bf16.mxu0 %v150_v23 }
  0x65   :  { %780 = vmatpush3.bf16.msra.mxu0 %v150_v23 }
  0x66   :  { %781 = vmatprep.subr.bf16.mxu0 %v151_v26 }
  0x69   :  { %782 = vmatpush3.bf16.msra.mxu0 %v151_v26 }
  0x6a   :  { %831 = vmatprep.subr.bf16.mxu0 %v433_v54 }
  0x6c   :  { %784 = vmatmul.mubr.bf16.vlgmr.msra.gmra.mrb[0].mxu0 %v121_v31 }
  0x6d   :  { %787 = vmatprep.mubr.bf16.mxu0 %v122_v32  ;;  %832 = vmatpush3.bf16.msra.mxu0 %v433_v54  ;;  %v87_v54 = vld [vmem:[#allocation3 + $0x38] sm:$0xff] }
  0x6e   :  { %833 = vmatprep.subr.bf16.mxu0 %v434_v56  ;;  %v1148_v57 = vpack.c.bf16 %v87_v54, %v86_v53  ;;  %v702_v53 = vld [vmem:[%s1194_s5] ss:$0 sm:$0xff]  ;;  %s1026_s5 = smov [#allocation11]  }
  0x6f   :  { %s687_s23 = sshll.u32 %s1026_s5, 4  ;;  %s688_s23 = int_to_ptr.vmem [resolvable:$true] %s687_s23 }
  0x70   :  { %s990_s25 = scalar_lea.vmem %s688_s23, 2048  ;;  %p995_p5 = scmp.lt.s32.totalorder %s688_s23, %s688_s23 }
  0x71   :  { %834 = vmatpush3.bf16.msra.mxu0 %v434_v56  ;;  %v89_v56 = vld [vmem:[#allocation3 + $0x48] sm:$0xff]  ;;  %p991_p4 = scmp.ne.s32.totalorder %s688_s23, %s990_s25  ;;  %p996_p6 = scmp.lt.s32.totalorder %s990_s25, %s990_s25 }
  0x72   :  { %835 = vmatprep.subr.bf16.mxu0 %v435_v59  ;;  %v1150_v58 = vpack.c.bf16 %v89_v56, %v88_v55 }
  0x73   :  { %p997_p7 = por %p996_p6, %p995_p5 }
  0x74   :  { %788 = vmatmul.mubr.bf16.gmra.mrb[4].mxu0 %v123_v37 }
  0x75   :  { %791 = vmatprep.mubr.bf16.mxu0 %v124_v38  ;;  %836 = vmatpush3.bf16.msra.mxu0 %v435_v59  ;;  %v90_v59 = vld [vmem:[#allocation3 + $0x50] sm:$0xff]  ;;  %p998_p8 = pnand %p997_p7, %p991_p4 }
  0x76   :  { %837 = vmatprep.subr.bf16.mxu0 %v436_v62  ;;  %v1154_v63 = vpack.c.bf16 %v91_v60, %v90_v59 }
  0x79   :  { %838 = vmatpush3.bf16.msra.mxu0 %v436_v62  ;;  %v93_v62 = vld [vmem:[#allocation3 + $0x68] sm:$0xff] }
  0x7a   :  { %839 = vmatprep.subr.bf16.mxu0 %v437_v1  ;;  %v1156_v0 = vpack.c.bf16 %v93_v62, %v92_v61 }
  0x7c   :  { %792 = vmatmul.mubr.bf16.gmra.mrb[8].mxu0 %v125_v43 }
  0x7d   :  { %795 = vmatprep.mubr.bf16.mxu0 %v126_v44  ;;  %840 = vmatpush3.bf16.msra.mxu0 %v437_v1  ;;  %v94_v1 = vld [vmem:[#allocation3 + $0x70] sm:$0xff] }
  0x7e   :  { %841 = vmatprep.subr.bf16.mxu0 %v438_v4  ;;  %v1160_v3 = vpack.c.bf16 %v95_v2, %v94_v1 }
  0x81   :  { %842 = vmatpush3.bf16.msra.mxu0 %v438_v4  ;;  %v429_v4 = vld [vmem:[#allocation9 + $0x60] sm:$0xff] }
  0x84   :  { %796 = vmatmul.mubr.bf16.gmra.mrb[12].mxu0 %v127_v47  ;;  %v83_v47 = vld [vmem:[#allocation3 + $0x18] sm:$0xff] }
  0x85   :  { %v1142_v51 = vpack.c.bf16 %v83_v47, %v82_v46 }
 0x13f   :  { %v785_v5 = vpop.f32.mrb[0].mxu0 }
 0x140   :  { %v193_v7 = vpop.f32.mrb[1].mxu0  ;;  %v202_v9 = vadd.f32 %v785_v5, %v701_v6  ;;  %v430_v5 = vld [vmem:[#allocation9 + $0x68] sm:$0xff] }
 0x141   :  { %v786_v8 = vpop.f32.mrb[2].mxu0  ;;  %v194_v12 = vadd.f32 %v701_v6, %v193_v7  ;;  %v431_v7 = vld [vmem:[#allocation9 + $0x70] sm:$0xff] }
 0x142   :  { %v205_v10 = vadd.f32 %v786_v8, %v701_v6  ;;  %v196_v11 = vpop.f32.mrb[3].mxu0  ;;  %v432_v8 = vld [vmem:[#allocation9 + $0x78] sm:$0xff] }
 0x143   :  { %v197_v13 = vadd.f32 %v701_v6, %v196_v11 }
 0x144   :  { %v257_v14 = vpack.c.bf16 %v205_v10, %v202_v9  ;;  %v440_v9 = vpack.c.bf16 %v432_v8, %v431_v7 }
 0x145   :  { %v256_v15 = vpack.c.bf16 %v197_v13, %v194_v12 }
 0x147   :  { %v789_v16 = vpop.f32.mrb[4].mxu0  ;;  %799 = vmatprep.subr.bf16.mxu1 %v256_v15 }
 0x148   :  { %v209_v17 = vpop.f32.mrb[5].mxu0  ;;  %800 = vmatpush3.bf16.msra.mxu1 %v256_v15  ;;  %v218_v19 = vadd.f32 %v789_v16, %v701_v6 }
 0x149   :  { %v790_v18 = vpop.f32.mrb[6].mxu0  ;;  %801 = vmatprep.subr.bf16.mxu1 %v257_v14  ;;  %v210_v22 = vadd.f32 %v701_v6, %v209_v17 }
 0x14a   :  { %v221_v20 = vadd.f32 %v790_v18, %v701_v6  ;;  %v212_v21 = vpop.f32.mrb[7].mxu0 }
 0x14b   :  { %v213_v23 = vadd.f32 %v701_v6, %v212_v21 }
 0x14c   :  { %v259_v24 = vpack.c.bf16 %v221_v20, %v218_v19  ;;  %802 = vmatpush3.bf16.msra.mxu1 %v257_v14 }
 0x14d   :  { %v258_v25 = vpack.c.bf16 %v213_v23, %v210_v22 }
 0x14f   :  { %v793_v26 = vpop.f32.mrb[8].mxu0  ;;  %803 = vmatprep.subr.bf16.mxu1 %v258_v25 }
 0x150   :  { %v225_v27 = vpop.f32.mrb[9].mxu0  ;;  %804 = vmatpush3.bf16.msra.mxu1 %v258_v25  ;;  %v234_v29 = vadd.f32 %v793_v26, %v701_v6 }
 0x151   :  { %v794_v28 = vpop.f32.mrb[10].mxu0  ;;  %805 = vmatprep.subr.bf16.mxu1 %v259_v24  ;;  %v226_v32 = vadd.f32 %v701_v6, %v225_v27 }
 0x152   :  { %v237_v30 = vadd.f32 %v794_v28, %v701_v6  ;;  %v228_v31 = vpop.f32.mrb[11].mxu0 }
 0x153   :  { %v229_v33 = vadd.f32 %v701_v6, %v228_v31 }
 0x154   :  { %v261_v34 = vpack.c.bf16 %v237_v30, %v234_v29  ;;  %806 = vmatpush3.bf16.msra.mxu1 %v259_v24 }
 0x155   :  { %v260_v35 = vpack.c.bf16 %v229_v33, %v226_v32 }
 0x157   :  { %v797_v36 = vpop.f32.mrb[12].mxu0  ;;  %807 = vmatprep.subr.bf16.mxu1 %v260_v35 }
 0x158   :  { %v241_v37 = vpop.f32.mrb[13].mxu0  ;;  %808 = vmatpush3.bf16.msra.mxu1 %v260_v35  ;;  %v250_v39 = vadd.f32 %v797_v36, %v701_v6 }
 0x159   :  { %v798_v38 = vpop.f32.mrb[14].mxu0  ;;  %809 = vmatprep.subr.bf16.mxu1 %v261_v34  ;;  %v242_v42 = vadd.f32 %v701_v6, %v241_v37 }
 0x15a   :  { %v253_v40 = vadd.f32 %v798_v38, %v701_v6  ;;  %v244_v41 = vpop.f32.mrb[15].mxu0 }
 0x15b   :  { %v245_v43 = vadd.f32 %v701_v6, %v244_v41  ;;  %v439_v6 = vpack.c.bf16 %v430_v5, %v429_v4 }
 0x15c   :  { %v263_v44 = vpack.c.bf16 %v253_v40, %v250_v39  ;;  %810 = vmatpush3.bf16.msra.mxu1 %v261_v34 }
 0x15d   :  { %v262_v45 = vpack.c.bf16 %v245_v43, %v242_v42  ;;  %843 = vmatprep.subr.bf16.mxu0 %v439_v6 }
 0x15e   :  { %844 = vmatpush3.bf16.msra.mxu0 %v439_v6 }
 0x15f   :  { %811 = vmatprep.subr.bf16.mxu1 %v262_v45  ;;  %845 = vmatprep.subr.bf16.mxu0 %v440_v9 }
 0x160   :  { %812 = vmatpush3.bf16.msra.mxu1 %v262_v45 }
 0x161   :  { %813 = vmatprep.subr.bf16.mxu1 %v263_v44 }
 0x162   :  { %846 = vmatpush3.bf16.msra.mxu0 %v440_v9 }
 0x164   :  { %814 = vmatpush3.bf16.msra.mxu1 %v263_v44 }
 0x167   :  { %816 = vmatmul.mubr.bf16.vlgmr.msra.gmra.mrb[0].mxu1 %v1142_v51 }
 0x168   :  { %819 = vmatprep.mubr.bf16.mxu1 %v1144_v52 }
 0x16f   :  { %820 = vmatmul.mubr.bf16.gmra.mrb[4].mxu1 %v1148_v57 }
 0x170   :  { %823 = vmatprep.mubr.bf16.mxu1 %v1150_v58 }
 0x177   :  { %824 = vmatmul.mubr.bf16.gmra.mrb[8].mxu1 %v1154_v63 }
 0x178   :  { %827 = vmatprep.mubr.bf16.mxu1 %v1156_v0 }
 0x17f   :  { %828 = vmatmul.mubr.bf16.gmra.mrb[12].mxu1 %v1160_v3 }
 0x180   :  { %879 = vmatprep.mubr.bf16.mxu1 %v1136_v50 }
 0x23a   :  { %v817_v10 = vpop.f32.mrb[0].mxu1 }
 0x23b   :  { %v298_v11 = vpop.f32.mrb[1].mxu1  ;;  %v363_v13 = vmax.f32 %v817_v10, 0.0 }
 0x23c   :  { %v818_v12 = vpop.f32.mrb[2].mxu1  ;;  %v361_v16 = vmax.f32 %v298_v11, 0.0 }
 0x23d   :  { %v364_v14 = vmax.f32 %v818_v12, 0.0  ;;  %v301_v15 = vpop.f32.mrb[3].mxu1 }
 0x23e   :  { %v362_v17 = vmax.f32 %v301_v15, 0.0 }
 0x23f   :  { %v410_v18 = vpack.c.bf16 %v364_v14, %v363_v13 }
 0x240   :  { %v409_v50 = vpack.c.bf16 %v362_v17, %v361_v16 }
 0x242   :  { %v821_v19 = vpop.f32.mrb[4].mxu1  ;;  %847 = vmatprep.mubr.bf16.mxu0 %v409_v50 }
 0x243   :  { %v314_v20 = vpop.f32.mrb[5].mxu1  ;;  %848 = vmatmul.mubr.bf16.vlgmr.msra.gmra.mrb[16].mxu0 %v410_v18  ;;  %v367_v22 = vmax.f32 %v821_v19, 0.0 }
 0x244   :  { %v822_v21 = vpop.f32.mrb[6].mxu1  ;;  %v365_v25 = vmax.f32 %v314_v20, 0.0 }
 0x245   :  { %v368_v23 = vmax.f32 %v822_v21, 0.0  ;;  %v317_v24 = vpop.f32.mrb[7].mxu1 }
 0x246   :  { %v366_v26 = vmax.f32 %v317_v24, 0.0 }
 0x247   :  { %v412_v27 = vpack.c.bf16 %v368_v23, %v367_v22 }
 0x248   :  { %v411_v28 = vpack.c.bf16 %v366_v26, %v365_v25 }
 0x24a   :  { %v825_v29 = vpop.f32.mrb[8].mxu1  ;;  %851 = vmatprep.mubr.bf16.mxu0 %v411_v28 }
 0x24b   :  { %v330_v30 = vpop.f32.mrb[9].mxu1  ;;  %852 = vmatmul.mubr.bf16.gmra.mrb[20].mxu0 %v412_v27  ;;  %v371_v32 = vmax.f32 %v825_v29, 0.0 }
 0x24c   :  { %v826_v31 = vpop.f32.mrb[10].mxu1  ;;  %v369_v35 = vmax.f32 %v330_v30, 0.0 }
 0x24d   :  { %v372_v33 = vmax.f32 %v826_v31, 0.0  ;;  %v333_v34 = vpop.f32.mrb[11].mxu1 }
 0x24e   :  { %v370_v36 = vmax.f32 %v333_v34, 0.0 }
 0x24f   :  { %v414_v37 = vpack.c.bf16 %v372_v33, %v371_v32 }
 0x250   :  { %v413_v38 = vpack.c.bf16 %v370_v36, %v369_v35 }
 0x252   :  { %v829_v39 = vpop.f32.mrb[12].mxu1  ;;  %855 = vmatprep.mubr.bf16.mxu0 %v413_v38 }
 0x253   :  { %v346_v40 = vpop.f32.mrb[13].mxu1  ;;  %856 = vmatmul.mubr.bf16.gmra.mrb[24].mxu0 %v414_v37  ;;  %v375_v42 = vmax.f32 %v829_v39, 0.0 }
 0x254   :  { %v830_v41 = vpop.f32.mrb[14].mxu1  ;;  %v373_v45 = vmax.f32 %v346_v40, 0.0 }
 0x255   :  { %v376_v43 = vmax.f32 %v830_v41, 0.0  ;;  %v349_v44 = vpop.f32.mrb[15].mxu1 }
 0x256   :  { %v374_v46 = vmax.f32 %v349_v44, 0.0 }
 0x257   :  { %v416_v47 = vpack.c.bf16 %v376_v43, %v375_v42 }
 0x258   :  { %v415_v48 = vpack.c.bf16 %v374_v46, %v373_v45 }
 0x25a   :  { %859 = vmatprep.mubr.bf16.mxu0 %v415_v48 }
 0x25b   :  { %860 = vmatmul.mubr.bf16.gmra.mrb[28].mxu0 %v416_v47 }
 0x316   :  { %v849_v49 = vpop.f32.mrb[16].mxu0 }
 0x317   :  { %v482_v54 = vpop.f32.mrb[17].mxu0  ;;  %v491_v56 = vadd.f32 %v849_v49, %v702_v53 }
 0x318   :  { %v850_v55 = vpop.f32.mrb[18].mxu0  ;;  %v483_v61 = vadd.f32 %v702_v53, %v482_v54 }
 0x319   :  { %v494_v59 = vadd.f32 %v850_v55, %v702_v53  ;;  %v485_v60 = vpop.f32.mrb[19].mxu0 }
 0x31a   :  { %v486_v62 = vadd.f32 %v702_v53, %v485_v60 }
 0x31b   :  { %v546_v1 = vpack.c.bf16 %v494_v59, %v491_v56 }
 0x31c   :  { %v545_v2 = vpack.c.bf16 %v486_v62, %v483_v61 }
 0x31e   :  { %v853_v4 = vpop.f32.mrb[20].mxu0  ;;  %863 = vmatprep.subr.bf16.mxu1 %v545_v2 }
 0x31f   :  { %v498_v5 = vpop.f32.mrb[21].mxu0  ;;  %864 = vmatpush3.bf16.msra.mxu1 %v545_v2  ;;  %v507_v7 = vadd.f32 %v853_v4, %v702_v53 }
 0x320   :  { %v854_v6 = vpop.f32.mrb[22].mxu0  ;;  %865 = vmatprep.subr.bf16.mxu1 %v546_v1  ;;  %v499_v10 = vadd.f32 %v702_v53, %v498_v5 }
 0x321   :  { %v510_v8 = vadd.f32 %v854_v6, %v702_v53  ;;  %v501_v9 = vpop.f32.mrb[23].mxu0 }
 0x322   :  { %v502_v11 = vadd.f32 %v702_v53, %v501_v9 }
 0x323   :  { %v548_v12 = vpack.c.bf16 %v510_v8, %v507_v7  ;;  %866 = vmatpush3.bf16.msra.mxu1 %v546_v1 }
 0x324   :  { %v547_v13 = vpack.c.bf16 %v502_v11, %v499_v10 }
 0x326   :  { %v857_v14 = vpop.f32.mrb[24].mxu0  ;;  %867 = vmatprep.subr.bf16.mxu1 %v547_v13 }
 0x327   :  { %v514_v15 = vpop.f32.mrb[25].mxu0  ;;  %868 = vmatpush3.bf16.msra.mxu1 %v547_v13  ;;  %v523_v17 = vadd.f32 %v857_v14, %v702_v53 }
 0x328   :  { %v858_v16 = vpop.f32.mrb[26].mxu0  ;;  %869 = vmatprep.subr.bf16.mxu1 %v548_v12  ;;  %v515_v19 = vadd.f32 %v702_v53, %v514_v15 }
 0x329   :  { %v526_v18 = vadd.f32 %v858_v16, %v702_v53  ;;  %v517_v50 = vpop.f32.mrb[27].mxu0 }
 0x32a   :  { %v518_v20 = vadd.f32 %v702_v53, %v517_v50 }
 0x32b   :  { %v550_v21 = vpack.c.bf16 %v526_v18, %v523_v17  ;;  %870 = vmatpush3.bf16.msra.mxu1 %v548_v12 }
 0x32c   :  { %v549_v22 = vpack.c.bf16 %v518_v20, %v515_v19 }
 0x32e   :  { %v861_v23 = vpop.f32.mrb[28].mxu0  ;;  %871 = vmatprep.subr.bf16.mxu1 %v549_v22 }
 0x32f   :  { %v530_v24 = vpop.f32.mrb[29].mxu0  ;;  %872 = vmatpush3.bf16.msra.mxu1 %v549_v22  ;;  %v539_v26 = vadd.f32 %v861_v23, %v702_v53 }
 0x330   :  { %v862_v25 = vpop.f32.mrb[30].mxu0  ;;  %873 = vmatprep.subr.bf16.mxu1 %v550_v21  ;;  %v531_v29 = vadd.f32 %v702_v53, %v530_v24 }
 0x331   :  { %v542_v27 = vadd.f32 %v862_v25, %v702_v53  ;;  %v533_v28 = vpop.f32.mrb[31].mxu0 }
 0x332   :  { %v534_v30 = vadd.f32 %v702_v53, %v533_v28 }
 0x333   :  { %v552_v31 = vpack.c.bf16 %v542_v27, %v539_v26  ;;  %874 = vmatpush3.bf16.msra.mxu1 %v550_v21 }
 0x334   :  { %v551_v32 = vpack.c.bf16 %v534_v30, %v531_v29 }
 0x336   :  { %875 = vmatprep.subr.bf16.mxu1 %v551_v32 }
 0x337   :  { %876 = vmatpush3.bf16.msra.mxu1 %v551_v32 }
 0x338   :  { %877 = vmatprep.subr.bf16.mxu1 %v552_v31 }
 0x33b   :  { %878 = vmatpush3.bf16.msra.mxu1 %v552_v31 }
 0x33e   :  { %880 = vmatmul.mubr.bf16.vlgmr.msra.gmra.mrb[16].mxu1 %v1142_v51 }
 0x33f   :  { %883 = vmatprep.mubr.bf16.mxu1 %v1144_v52 }
 0x346   :  { %884 = vmatmul.mubr.bf16.gmra.mrb[20].mxu1 %v1148_v57 }
 0x347   :  { %887 = vmatprep.mubr.bf16.mxu1 %v1150_v58 }
 0x34e   :  { %888 = vmatmul.mubr.bf16.gmra.mrb[24].mxu1 %v1154_v63 }
 0x34f   :  { %891 = vmatprep.mubr.bf16.mxu1 %v1156_v0 }
 0x356   :  { %892 = vmatmul.mubr.bf16.gmra.mrb[28].mxu1 %v1160_v3 }
 0x411   :  { %v881_v33 = vpop.f32.mrb[16].mxu1 }
 0x412   :  { %v652_v34 = vmax.f32 %v881_v33, 0.0  ;;  %v587_v35 = vpop.f32.mrb[17].mxu1 }
 0x413   :  { %v650_v36 = vmax.f32 %v587_v35, 0.0  ;;  %v882_v37 = vpop.f32.mrb[18].mxu1 }
 0x414   :  { %668 = vst [vmem:[#allocation11 + $0x10] sm:$0xff] %v652_v34  ;;  %v653_v38 = vmax.f32 %v882_v37, 0.0  ;;  %v590_v51 = vpop.f32.mrb[19].mxu1 }
 0x415   :  { %666 = vst [vmem:[#allocation11] sm:$0xff] %v650_v36  ;;  %v651_v52 = vmax.f32 %v590_v51, 0.0 }
 0x416   :  { %669 = vst [vmem:[#allocation11 + $0x18] sm:$0xff] %v653_v38 }
 0x417   :  { %667 = vst [vmem:[#allocation11 + $0x8] sm:$0xff] %v651_v52 }
 0x419   :  { %v885_v57 = vpop.f32.mrb[20].mxu1 }
 0x41a   :  { %v656_v58 = vmax.f32 %v885_v57, 0.0  ;;  %v603_v39 = vpop.f32.mrb[21].mxu1 }
 0x41b   :  { %v654_v63 = vmax.f32 %v603_v39, 0.0  ;;  %v886_v40 = vpop.f32.mrb[22].mxu1 }
 0x41c   :  { %672 = vst [vmem:[#allocation11 + $0x30] sm:$0xff] %v656_v58  ;;  %v657_v0 = vmax.f32 %v886_v40, 0.0  ;;  %v606_v3 = vpop.f32.mrb[23].mxu1 }
 0x41d   :  { %670 = vst [vmem:[#allocation11 + $0x20] sm:$0xff] %v654_v63  ;;  %v655_v41 = vmax.f32 %v606_v3, 0.0 }
 0x41e   :  { %673 = vst [vmem:[#allocation11 + $0x38] sm:$0xff] %v657_v0 }
 0x41f   :  { %671 = vst [vmem:[#allocation11 + $0x28] sm:$0xff] %v655_v41 }
 0x421   :  { %v889_v42 = vpop.f32.mrb[24].mxu1 }
 0x422   :  { %v660_v43 = vmax.f32 %v889_v42, 0.0  ;;  %v619_v44 = vpop.f32.mrb[25].mxu1 }
 0x423   :  { %v658_v45 = vmax.f32 %v619_v44, 0.0  ;;  %v890_v46 = vpop.f32.mrb[26].mxu1 }
 0x424   :  { %676 = vst [vmem:[#allocation11 + $0x50] sm:$0xff] %v660_v43  ;;  %v661_v47 = vmax.f32 %v890_v46, 0.0  ;;  %v622_v48 = vpop.f32.mrb[27].mxu1 }
 0x425   :  { %674 = vst [vmem:[#allocation11 + $0x40] sm:$0xff] %v658_v45  ;;  %v659_v49 = vmax.f32 %v622_v48, 0.0 }
 0x426   :  { %677 = vst [vmem:[#allocation11 + $0x58] sm:$0xff] %v661_v47 }
 0x427   :  { %675 = vst [vmem:[#allocation11 + $0x48] sm:$0xff] %v659_v49 }
 0x429   :  { %v893_v53 = vpop.f32.mrb[28].mxu1 }
 0x42a   :  { %v664_v54 = vmax.f32 %v893_v53, 0.0  ;;  %v635_v55 = vpop.f32.mrb[29].mxu1 }
 0x42b   :  { %v662_v56 = vmax.f32 %v635_v55, 0.0  ;;  %v894_v59 = vpop.f32.mrb[30].mxu1 }
 0x42c   :  { %680 = vst [vmem:[#allocation11 + $0x70] sm:$0xff] %v664_v54  ;;  %v665_v60 = vmax.f32 %v894_v59, 0.0  ;;  %v638_v61 = vpop.f32.mrb[31].mxu1 }
 0x42d   :  { %678 = vst [vmem:[#allocation11 + $0x60] sm:$0xff] %v662_v56  ;;  %v663_v62 = vmax.f32 %v638_v61, 0.0 }
 0x42e   :  { %681 = vst [vmem:[#allocation11 + $0x78] sm:$0xff] %v665_v60 }
 0x42f   :  { %679 = vst [vmem:[#allocation11 + $0x68] sm:$0xff] %v663_v62 }
 0x430   :  { %1001 = shalt.err (!%p998_p8)
}
 0x431   :  { %s1002_s28 = scalar_lea.hbm %s1195_s6, 2048 }
 0x432   :  { %p1003_p9 = scmp.ne.s32.totalorder %s1195_s6, %s1002_s28  ;;  %p1006_p10 = scmp.lt.u32.totalorder %s1002_s28, %s1195_s6 }
 0x434   :  { %p1008_p11 = pnand %p1006_p10, %p1003_p9 }
 0x436   :  { %1011 = shalt.err (!%p1008_p11)
}
 0x437   :  { %693 = dma.vmem_to_hbm [thread:$0]  %s688_s23, 2048, %s1195_s6, [#allocation5], %s1022_s9, %s1022_s9, %s1023_s10  }
 0x438   :  { %1018 = dma.done.wait [#allocation5], 2048  }
 0x439   :  { %1019 = vsyncadd [#allocation5], 4294965248 }
 0x43a   :  { %697 = vsyncpa [#allocation4], 1 }
 0x43b   :  { %698 = vsyncpa [#allocation7], 1 }
 0x43c   :  { %699 = vsyncpa [#allocation10], 1 }
 0x43d   :  { %700 = vsyncpa [#allocation5], 1 }

</bundles_post_ra>
